<compile_context>
chip_gen: v6e
topology: v6e:2x2x1
jax: 0.10.0
libtpu: 0.0.40
codegen_flags: <defaults>
</compile_context>

<pallas_src>
import jax
import jax.numpy as jnp
from jax.experimental import pallas as pl
from jax.experimental.pallas import tpu as pltpu

EPS = 1e-5


def _round_up(x, m):
    return ((x + m - 1) // m) * m


def _prenorm_kernel(x_ref, gamma_ref, beta_ref, w_ref, b_ref, o_ref):
    # x_ref: (TM, D), gamma/beta: (1, D), w: (D, TN), b: (1, TN), o: (TM, TN)
    x = x_ref[...].astype(jnp.float32)
    d = x.shape[-1]
    inv_d = 1.0 / d
    # One-pass statistics: E[x] and E[x^2] together (single elementwise pass,
    # two independent cross-lane reductions).  f32 keeps this stable for LN.
    s = jnp.sum(x, axis=-1, keepdims=True)
    ss = jnp.sum(x * x, axis=-1, keepdims=True)
    mean = s * inv_d
    var = jnp.maximum(ss * inv_d - mean * mean, 0.0)  # biased var (PyTorch LN)
    xn = (x - mean) * jax.lax.rsqrt(var + EPS)
    y = xn * gamma_ref[...].astype(jnp.float32) + beta_ref[...].astype(jnp.float32)
    # Feed the MXU in the weight dtype (bf16-native on v6e/v7x); f32 accumulate.
    y = y.astype(w_ref.dtype)
    out = jnp.dot(y, w_ref[...], preferred_element_type=jnp.float32)
    out = out + b_ref[...].astype(jnp.float32)
    o_ref[...] = out.astype(o_ref.dtype)


def _maybe_single_buffered_spec(block_shape, index_map, single):
    """BlockSpec, single-buffered for constant-index blocks when supported."""
    if single:
        try:
            return pl.BlockSpec(block_shape, index_map, pipeline_mode=pl.Buffered(1))
        except (TypeError, ValueError, AttributeError):
            pass  # older API: fall back to default double buffering
    return pl.BlockSpec(block_shape, index_map)


def prenorm_linear(x, gamma, beta, w, b, *, tm=None, tn=None):
    """x: (B, N, D) -> (B, N, H). Fused LayerNorm(D) + Linear(D, H)."""
    B, N, D = x.shape
    H = w.shape[1]
    M = B * N

    sub = 16 if x.dtype == jnp.bfloat16 else 8
    isz = lambda dt: jnp.dtype(dt).itemsize

    # Generation-aware VMEM budget (v5e/v6e: 128 MiB, v7x: 64 MiB per TC),
    # leaving headroom for compiler scratch.
    try:
        vmem_cap = int(pltpu.get_tpu_info().vmem_capacity_bytes)
    except Exception:
        vmem_cap = 64 * 1024 * 1024
    usable = int(vmem_cap * 3 // 4)

    # Lane-dense output: pad H up to a multiple of 128 (unmasked vst, full MXU N).
    Hp = _round_up(H, 128)
    # H tile: full Hp unless the resident (D, Hp) weight tile is large, in
    # which case tile H so the token tile can stay big.
    if tn is None:
        tn = Hp if D * Hp * isz(w.dtype) <= 8 * 1024 * 1024 else 1024
    tn = _round_up(min(tn, Hp), 128)
    Hp = _round_up(Hp, tn)
    nj = Hp // tn
    const_wb = nj == 1  # w / b block index is constant across the grid
    wb_bufs = 1 if const_wb else 2

    # Token tile: mem-bound sweet spot is 512-1024 rows, but (a) keep at least
    # two M-grid steps so both v7x TensorCores get work, and (b) fit VMEM.
    if tm is None:
        tm = 1024
    tm = max(sub, min(_round_up(tm, sub), _round_up(pl.cdiv(M, 2), sub)))

    def _budget(tm_):
        x_t = 2 * tm_ * D * isz(x.dtype)                 # double-buffered input
        o_t = 2 * tm_ * tn * isz(x.dtype)                # double-buffered output
        w_t = wb_bufs * D * tn * isz(w.dtype)            # weight tile
        small = 2 * D * isz(gamma.dtype) + wb_bufs * tn * isz(b.dtype)
        f32_tmp = tm_ * (2 * D + tn) * 4                 # in-kernel f32 temporaries
        return x_t + o_t + w_t + small + f32_tmp

    while tm > sub and _budget(tm) > usable:
        tm = max(sub, _round_up(tm // 2, sub))

    nm = pl.cdiv(M, tm)  # ragged last block: OOB rows are discarded on store
    vmem_limit = int(min(max(_budget(tm) * 5 // 4, 16 * 1024 * 1024), usable))

    x2 = x.reshape(M, D)  # no token-axis padding (saves full HBM passes)
    gamma2 = gamma.reshape(1, D)
    beta2 = beta.reshape(1, D)
    w2 = w if Hp == H else jnp.pad(w, ((0, 0), (0, Hp - H)))
    b2 = (b if Hp == H else jnp.pad(b, ((0, Hp - H),))).reshape(1, Hp)

    out2 = pl.pallas_call(
        _prenorm_kernel,
        out_shape=jax.ShapeDtypeStruct((M, Hp), x.dtype),
        grid_spec=pltpu.PrefetchScalarGridSpec(
            num_scalar_prefetch=0,
            grid=(nm, nj),
            in_specs=[
                pl.BlockSpec((tm, D), lambda i, j: (i, 0)),
                _maybe_single_buffered_spec((1, D), lambda i, j: (0, 0), True),
                _maybe_single_buffered_spec((1, D), lambda i, j: (0, 0), True),
                _maybe_single_buffered_spec((D, tn), lambda i, j: (0, j), const_wb),
                _maybe_single_buffered_spec((1, tn), lambda i, j: (0, j), const_wb),
            ],
            out_specs=pl.BlockSpec((tm, tn), lambda i, j: (i, j)),
        ),
        compiler_params=pltpu.CompilerParams(
            dimension_semantics=("parallel", "parallel"),
            vmem_limit_bytes=vmem_limit,
        ),
    )(x2, gamma2, beta2, w2, b2)

    if Hp != H:
        out2 = out2[:, :H]
    return out2.reshape(B, N, H)


def prenorm_linear_ref(x, gamma, beta, w, b):
    xf = x.astype(jnp.float32)
    mean = jnp.mean(xf, axis=-1, keepdims=True)
    var = jnp.mean((xf - mean) ** 2, axis=-1, keepdims=True)
    y = (xf - mean) / jnp.sqrt(var + EPS) * gamma.astype(jnp.float32) + beta.astype(jnp.float32)
    return (y @ w.astype(jnp.float32) + b.astype(jnp.float32)).astype(x.dtype)


if __name__ == "__main__":
    key = jax.random.PRNGKey(0)
    k1, k2, k3, k4, k5, k6, k7 = jax.random.split(key, 7)

    # --- case 1: tiny smoke test (D=32 < 128 lanes, H=64 -> padded to 128) ---
    B, N, D, H = 2, 8, 32, 64
    x = jax.random.normal(k1, (B, N, D), dtype=jnp.float32)
    gamma = jnp.ones((D,), dtype=jnp.float32)       # nn.LayerNorm default init
    beta = jnp.zeros((D,), dtype=jnp.float32)
    w = jax.random.normal(k2, (D, H), dtype=jnp.float32) * 0.02
    b = jax.random.normal(k3, (H,), dtype=jnp.float32) * 0.02
    out = jax.block_until_ready(prenorm_linear(x, gamma, beta, w, b))
    ref = prenorm_linear_ref(x, gamma, beta, w, b)
    assert out.shape == (B, N, H)
    assert jnp.allclose(out, ref, atol=1e-4, rtol=1e-4)

    # --- case 2: lane-aligned dims, ragged token grid (M=406, 2 M-steps) ---
    B2, N2, D2, H2 = 2, 203, 128, 256
    x2 = jax.random.normal(k4, (B2, N2, D2), dtype=jnp.float32)
    g2 = jnp.ones((D2,), dtype=jnp.float32)
    be2 = jnp.zeros((D2,), dtype=jnp.float32)
    w2 = jax.random.normal(k5, (D2, H2), dtype=jnp.float32) * 0.02
    b2 = jax.random.normal(k6, (H2,), dtype=jnp.float32) * 0.02
    out2 = jax.block_until_ready(prenorm_linear(x2, g2, be2, w2, b2))
    ref2 = prenorm_linear_ref(x2, g2, be2, w2, b2)
    assert out2.shape == (B2, N2, H2)
    assert jnp.allclose(out2, ref2, atol=1e-4, rtol=1e-4)

    # --- case 3: exercise the H-tiled grid path (tn=128 -> 2x2 grid) ---
    B3, N3 = 2, 64
    x3 = jax.random.normal(k7, (B3, N3, D2), dtype=jnp.float32)
    out3 = jax.block_until_ready(prenorm_linear(x3, g2, be2, w2, b2, tn=128))
    ref3 = prenorm_linear_ref(x3, g2, be2, w2, b2)
    assert out3.shape == (B3, N3, H2)
    assert jnp.allclose(out3, ref3, atol=1e-4, rtol=1e-4)

    # --- case 4: bf16 activations/weights (bf16 MXU feed, ragged M) ---
    B4, N4, D4, H4 = 2, 40, 128, 128
    x4 = jax.random.normal(k1, (B4, N4, D4), dtype=jnp.bfloat16)
    g4 = jnp.ones((D4,), dtype=jnp.bfloat16)
    be4 = jnp.zeros((D4,), dtype=jnp.bfloat16)
    w4 = (jax.random.normal(k2, (D4, H4), dtype=jnp.float32) * 0.02).astype(jnp.bfloat16)
    b4 = (jax.random.normal(k3, (H4,), dtype=jnp.float32) * 0.02).astype(jnp.bfloat16)
    out4 = jax.block_until_ready(prenorm_linear(x4, g4, be4, w4, b4))
    ref4 = prenorm_linear_ref(x4, g4, be4, w4, b4)
    assert out4.shape == (B4, N4, H4)
    assert jnp.allclose(out4.astype(jnp.float32), ref4.astype(jnp.float32),
                        atol=2e-2, rtol=2e-2)

    print("KERNEL_OK")
</pallas_src>

<mosaic_0001>
module attributes {stable_mosaic.version = 11 : i64} {
  func.func @_prenorm_kernel(%arg0: i32, %arg1: i32, %arg2: memref<8x32xf32, #tpu.memory_space<vmem>>, %arg3: memref<1x32xf32, #tpu.memory_space<vmem>>, %arg4: memref<1x32xf32, #tpu.memory_space<vmem>>, %arg5: memref<32x128xf32, #tpu.memory_space<vmem>>, %arg6: memref<1x128xf32, #tpu.memory_space<vmem>>, %arg7: memref<8x128xf32, #tpu.memory_space<vmem>>) attributes {dimension_semantics = [#tpu.dimension_semantics<parallel>, #tpu.dimension_semantics<parallel>], iteration_bounds = array<i64: 2, 1>, scalar_prefetch = 0 : i64, scratch_operands = 0 : i64, tpu.core_type = #tpu.core_type<tc>, window_params = [{transform_indices = @transform_0, window_bounds = array<i64: 8, 32>}, {pipeline_mode = #tpu.pipeline_mode<synchronous>, transform_indices = @transform_1, window_bounds = array<i64: 1, 32>}, {pipeline_mode = #tpu.pipeline_mode<synchronous>, transform_indices = @transform_2, window_bounds = array<i64: 1, 32>}, {pipeline_mode = #tpu.pipeline_mode<synchronous>, transform_indices = @transform_3, window_bounds = array<i64: 32, 128>}, {pipeline_mode = #tpu.pipeline_mode<synchronous>, transform_indices = @transform_4, window_bounds = array<i64: 1, 128>}, {transform_indices = @transform_5, window_bounds = array<i64: 8, 128>}]} {
    %c0 = arith.constant 0 : index
    %c0_0 = arith.constant 0 : index
    %0 = vector.load %arg2[%c0, %c0_0] : memref<8x32xf32, #tpu.memory_space<vmem>>, vector<8x32xf32>
    %cst = arith.constant dense<0.000000e+00> : vector<8xf32>
    %1 = vector.multi_reduction <add>, %0, %cst [1] : vector<8x32xf32> to vector<8xf32>
    %2 = vector.shape_cast %1 : vector<8xf32> to vector<8x1xf32>
    %3 = arith.mulf %0, %0 : vector<8x32xf32>
    %cst_1 = arith.constant dense<0.000000e+00> : vector<8xf32>
    %4 = vector.multi_reduction <add>, %3, %cst_1 [1] : vector<8x32xf32> to vector<8xf32>
    %5 = vector.shape_cast %4 : vector<8xf32> to vector<8x1xf32>
    %cst_2 = arith.constant 3.125000e-02 : f32
    %6 = vector.broadcast %cst_2 : f32 to vector<8x1xf32>
    %7 = arith.mulf %2, %6 : vector<8x1xf32>
    %cst_3 = arith.constant 3.125000e-02 : f32
    %8 = vector.broadcast %cst_3 : f32 to vector<8x1xf32>
    %9 = arith.mulf %5, %8 : vector<8x1xf32>
    %10 = arith.mulf %7, %7 : vector<8x1xf32>
    %11 = arith.subf %9, %10 : vector<8x1xf32>
    %cst_4 = arith.constant 0.000000e+00 : f32
    %12 = vector.broadcast %cst_4 : f32 to vector<8x1xf32>
    %13 = arith.maximumf %11, %12 : vector<8x1xf32>
    %14 = vector.broadcast %7 : vector<8x1xf32> to vector<8x32xf32>
    %15 = arith.subf %0, %14 : vector<8x32xf32>
    %cst_5 = arith.constant 9.99999974E-6 : f32
    %16 = vector.broadcast %cst_5 : f32 to vector<8x1xf32>
    %17 = arith.addf %13, %16 : vector<8x1xf32>
    %18 = math.rsqrt %17 : vector<8x1xf32>
    %19 = vector.broadcast %18 : vector<8x1xf32> to vector<8x32xf32>
    %20 = arith.mulf %15, %19 : vector<8x32xf32>
    %c0_6 = arith.constant 0 : index
    %c0_7 = arith.constant 0 : index
    %21 = vector.load %arg3[%c0_6, %c0_7] : memref<1x32xf32, #tpu.memory_space<vmem>>, vector<1x32xf32>
    %22 = vector.broadcast %21 : vector<1x32xf32> to vector<8x32xf32>
    %23 = arith.mulf %20, %22 : vector<8x32xf32>
    %c0_8 = arith.constant 0 : index
    %c0_9 = arith.constant 0 : index
    %24 = vector.load %arg4[%c0_8, %c0_9] : memref<1x32xf32, #tpu.memory_space<vmem>>, vector<1x32xf32>
    %25 = vector.broadcast %24 : vector<1x32xf32> to vector<8x32xf32>
    %26 = arith.addf %23, %25 : vector<8x32xf32>
    %c0_10 = arith.constant 0 : index
    %c0_11 = arith.constant 0 : index
    %27 = vector.load %arg5[%c0_10, %c0_11] : memref<32x128xf32, #tpu.memory_space<vmem>>, vector<32x128xf32>
    %cst_12 = arith.constant dense<0.000000e+00> : vector<8x128xf32>
    %28 = tpu.matmul %26, %27, %cst_12 {dimension_numbers = #tpu.dot_dimension_numbers<[1], [0], [0], [1], [0, 0, 1, 1], [], []>} : vector<8x32xf32>, vector<32x128xf32>, vector<8x128xf32> -> vector<8x128xf32>
    %c0_13 = arith.constant 0 : index
    %c0_14 = arith.constant 0 : index
    %29 = vector.load %arg6[%c0_13, %c0_14] : memref<1x128xf32, #tpu.memory_space<vmem>>, vector<1x128xf32>
    %30 = vector.broadcast %29 : vector<1x128xf32> to vector<8x128xf32>
    %31 = arith.addf %28, %30 : vector<8x128xf32>
    %c0_15 = arith.constant 0 : index
    %c0_16 = arith.constant 0 : index
    %32 = vector.load %arg7[%c0_15, %c0_16] : memref<8x128xf32, #tpu.memory_space<vmem>>, vector<8x128xf32>
    tpu.vector_store %arg7[%c0_15, %c0_16], %31 {strides = array<i32>} : memref<8x128xf32, #tpu.memory_space<vmem>>, vector<8x128xf32>,
    return
  }
  func.func @transform_0(%arg0: i32, %arg1: i32) -> (i32, i32) {
    %c0_i32 = arith.constant 0 : i32
    %c0_i32_0 = arith.constant 0 : i32
    return %arg0, %c0_i32 : i32, i32
  }
  func.func @transform_1(%arg0: i32, %arg1: i32) -> (i32, i32) {
    %c0_i32 = arith.constant 0 : i32
    %c0_i32_0 = arith.constant 0 : i32
    %c0_i32_1 = arith.constant 0 : i32
    return %c0_i32, %c0_i32_0 : i32, i32
  }
  func.func @transform_2(%arg0: i32, %arg1: i32) -> (i32, i32) {
    %c0_i32 = arith.constant 0 : i32
    %c0_i32_0 = arith.constant 0 : i32
    %c0_i32_1 = arith.constant 0 : i32
    return %c0_i32, %c0_i32_0 : i32, i32
  }
  func.func @transform_3(%arg0: i32, %arg1: i32) -> (i32, i32) {
    %c0_i32 = arith.constant 0 : i32
    %c0_i32_0 = arith.constant 0 : i32
    return %c0_i32, %arg1 : i32, i32
  }
  func.func @transform_4(%arg0: i32, %arg1: i32) -> (i32, i32) {
    %c0_i32 = arith.constant 0 : i32
    %c0_i32_0 = arith.constant 0 : i32
    return %c0_i32, %arg1 : i32, i32
  }
  func.func @transform_5(%arg0: i32, %arg1: i32) -> (i32, i32) {
    %c0_i32 = arith.constant 0 : i32
    return %arg0, %arg1 : i32, i32
  }
}

</mosaic_0001>

<bundles_post_ra>
// kernel: tpu_custom_call.1
= control target key start
LH: loop header
LB: loop body
LE: loop exit
PB: predicated region body
PF: predicated region fallthrough
CT: control target
= control target key end

     0   :  { %s1008_s0 = inlined_call_operand.hbm [shape: f32[16,32], index: 0, kind: input, shape index: {}]   ;;  %s1009_s1 = inlined_call_operand.vmem [shape: f32[1,32], index: 1, kind: input, shape index: {}]   ;;  %s1010_s2 = inlined_call_operand.vmem [shape: f32[1,32], index: 2, kind: input, shape index: {}]   ;;  %s1011_s3 = inlined_call_operand.hbm [shape: f32[32,128], index: 3, kind: input, shape index: {}]   ;;  %s1012_s4 = inlined_call_operand.vmem [shape: f32[1,128], index: 4, kind: input, shape index: {}]   ;;  %s1013_s5 = inlined_call_operand.hbm [shape: f32[16,128], index: 5, kind: output, shape index: {}]  }
   0x1   :  { %1016 = sst [smem:[#allocation12_spill]] %s1011_s3 }
   0x2   :  { %10 = vsyncpa [#allocation3], 0 }
   0x3   :  { %12 = vsyncpa [#allocation3 + $0x1], 0 }
   0x4   :  { %13 = vsyncpa [#allocation6], 0 }
   0x5   :  { %14 = vsyncpa [#allocation4], 0 }
   0x6   :  { %16 = vsyncpa [#allocation4 + $0x1], 0  ;;  %s819_s18 = smov 0   ;;  %s821_s19 = smov 0  }
   0x7   :  { %s823_s20 = smov 0   ;;  %s825_s21 = smov 0  }
   0x8   :  { %s827_s22 = smov 0   ;;  %s829_s23 = smov 0  }
   0x9 LB: > { %s527_s24 = sadd.s32 4294967295, %s780_s23   ;;  %s528_s25 = sadd.s32 4294967294, %s780_s23   ;;  %s780_s23 = sphi %s829_s23, %s22_s23   ;;  %s776_s22 = sphi %s827_s22, %s1036_s22   ;;  %s772_s21 = sphi %s825_s21, %s1035_s21   ;;  %s768_s20 = sphi %s823_s20, %s1034_s20   ;;  %s764_s19 = sphi %s821_s19, %s1033_s19   ;;  %s760_s18 = sphi %s819_s18, %s1032_s18  }
   0xa   : > { %p54_p0 = scmp.ne.s32.totalorder %s764_s19, %s760_s18  ;;  %p853_p1 = scmp.eq.s32.totalorder %s527_s24, 0 }
   0xb   : > { %p857_p2 = scmp.eq.s32.totalorder %s527_s24, 1  ;;  %p180_p3 = scmp.eq.s32.totalorder %s528_s25, 1 }
   0xc   : > { %p863_p4 = por %p853_p1, %p54_p0  ;;  %p529_p5 = scmp.ge.s32.totalorder %s780_s23, 1 }
   0xd   : > { %p868_p6 = por %p180_p3, %p54_p0  ;;  %p187_p7 = scmp.lt.s32.totalorder %s780_s23, 3 }
   0xe   : > { %s1019_s28 = scalar_select %p863_p4, 1, 0 }
   0xf   : > { %s1020_s29 = scalar_select %p868_p6, 1, 0 }
  0x10   : > { %p873_p8 = pnand %p529_p5, %p187_p7  ;;  %s782_s6 = smov [#allocation5]  }
  0x11   : > { %s207_s7 = sshll.u32 %s782_s6, 4  ;;  %s34_s9 = sadd.s32 1, %s776_s22  ;;  %s208_s7 = int_to_ptr.vmem [resolvable:$true] %s207_s7 }
  0x12   : > { %p571_p9 = pneg %p873_p8  ;;  %s653_s10 = scalar_lea.vmem %s208_s7, 512 }
  0x13   : > { %p654_p13 = scmp.ne.s32.totalorder %s208_s7, %s653_s10  ;;  %p661_p5 = scmp.lt.s32.totalorder %s208_s7, %s208_s7 }
  0x14   : > { %p882_p11 = pnand %p571_p9, %p853_p1  ;;  %p662_p7 = scmp.lt.s32.totalorder %s653_s10, %s653_s10 }
  0x16   : > { %p644_p12 = pneg %p882_p11  ;;  %p663_p6 = por %p662_p7, %p661_p5 }
  0x18   : > { %p656_p0 = pnand %p654_p13, %p644_p12 }
  0x1a   : > { %p657_p3 = pneg %p656_p0 }
  0x1c   : > { %p664_p4 = pnand %p663_p6, %p657_p3 }
  0x1e   : > { %667 = shalt.err (!%p664_p4)
}
  0x1f   : > { %s783_s11 = smov 128   ;;  %s784_s12 = smov 8  }
  0x20   : > { %s1023_s3 = sld [smem:[#allocation12_spill]]  ;;  %p36_p6 = scmp.ge.s32.totalorder %s34_s9, 2 }
  0x21   : > { %s41_s15 = sadd.s32 1, %s768_s20  ;;  %p48_p4 = scmp.ne.s32.totalorder %s768_s20, %s764_s19 }
  0x22   : > { %p49_p9 = scmp.eq.s32.totalorder %s780_s23, 0  ;;  %s1038_s9 = smov (%p36_p6, %s34_s9), 0 }
  0x23   : > { %1024 = sst [smem:[#allocation11_spill]] %s1038_s9  ;;  %p906_p13 = por %p857_p2, %p48_p4 }
  0x24   : > { %p900_p12 = por %p49_p9, %p48_p4  ;;  %s38_s24 = ssub.s32 %s776_s22, %s1038_s9 }
  0x25   : > { %p584_p0 = scmp.lt.s32.totalorder %s780_s23, 2  ;;  %s227_s25 = sand.u32 1, %s768_s20  }
  0x26   : > { %574 = dma.hbm_to_vmem [thread:$0]  (!%p882_p11), %s1023_s3, 512, %s208_s7, [#allocation6], %s783_s11, %s783_s11, %s784_s12  }
  0x27   : > { %p39_p11 = scmp.eq.s32.totalorder %s38_s24, 0  ;;  %s533_s6 = sshll.u32 %s227_s25, 3 }
  0x28   : > { %s534_s8 = sshll.u32 %s776_s22, 7  ;;  %s231_s13 = scalar_lea.vmem [#allocation2], %s533_s6 }
  0x29   : > { %s915_s7 = scalar_select %p39_p11, %s768_s20, %s41_s15  }
  0x2a   : > { %s236_s12 = scalar_lea.hbm %s1008_s0, %s534_s8  ;;  %s238_s14 = sshll.u32 %s231_s13, 4  ;;  %s239_s14 = int_to_ptr.vmem [resolvable:$true] %s238_s14 }
  0x2b   : > { %p923_p2 = pnand %p584_p0, %p900_p12  ;;  %s228_s3 = scalar_lea.sflag [#allocation3], %s227_s25 }
  0x2c   : > { %s681_s24 = scalar_lea.vmem %s239_s14, 128  ;;  %s785_s15 = smov [#allocation2]  }
  0x2d   : > { %p670_p3 = pneg %p923_p2  ;;  %p682_p5 = scmp.ne.s32.totalorder %s239_s14, %s681_s24 }
  0x2e   : > { %s686_s9 = sshll.u32 %s785_s15, 4  ;;  %s687_s9 = int_to_ptr.vmem [resolvable:$false] %s686_s9 }
  0x2f   : > { %p684_p7 = pnand %p682_p5, %p670_p3  ;;  %s688_s8 = scalar_lea.vmem %s687_s9, 256 }
  0x30   : > { %p689_p4 = scmp.lt.s32.totalorder %s239_s14, %s687_s9  ;;  %p690_p9 = scmp.lt.s32.totalorder %s688_s8, %s681_s24 }
  0x31   : > { %p685_p6 = pneg %p684_p7 }
  0x32   : > { %p691_p11 = por %p690_p9, %p689_p4 }
  0x34   : > { %p692_p10 = pnand %p691_p11, %p685_p6 }
  0x36   : > { %695 = shalt.err (!%p692_p10)
}
  0x37   : > { %578 = dma.hbm_to_vmem [thread:$0]  (!%p923_p2), %s236_s12, 128, %s239_s14, %s228_s3  }
  0x38   : > { %247 = sbr.rel (%p873_p8) target bundleno = 444 (0x1bc), region = 40  ;;  %s934_s16 = sand.u32 (!%p873_p8), 1, %s764_s19  }
  0x39   : > { %s536_s25 = sshll.u32 (!%p873_p8), %s934_s16, 3  ;;  %s250_s6 = scalar_lea.sflag (!%p873_p8), [#allocation3], %s934_s16 }
  0x3a   : > { %s253_s9 = scalar_lea.vmem (!%p873_p8), [#allocation2], %s536_s25  ;;  %p1028_p12 = scmp.ne.s32.totalorder (!%p873_p8), %s1019_s28, 0 }
  0x3d   : > { %747 = dma.done.wait (%p1028_p12), %s250_s6, 128  }
  0x3e   : > { %749 = vsyncadd (%p1028_p12), %s250_s6, 4294967168 }
  0x3f   : > { %751 = dma.done.wait (%p853_p1), [#allocation6], 512  }
  0x40   : > { %753 = vsyncadd (%p853_p1), [#allocation6], 4294966784  ;;  %vm291_vm0 = vcmask 261120   ;;  %v290_v0 = vld [vmem:[%s253_s9] sm:$0xff]  ;;  %v786_v5 = vmov 0.0   ;;  %vm787_vm1 = vmmov 0  }
  0x41   : > { %v292_v1 = vsel %vm291_vm0, %v290_v0, 0.0  ;;  %v295_v2 = vmul.f32 %v290_v0, %v290_v0  ;;  %v327_v4 = vld [vmem:[#allocation5 + $0x18] sm:$0xff]  ;;  %552 = vmatprep.subr.mxu0 %v786_v5  ;;  %v326_v6 = vld [vmem:[#allocation5 + $0x10] sm:$0xff]  ;;  %560 = vmatprep.mubr.msk.f32.mxu0 %vm787_vm1, %v786_v5  ;;  %v325_v7 = vld [vmem:[#allocation5 + $0x8] sm:$0xff]  ;;  %s544_s12 = sshll.u32 %s772_s21, 7  ;;  %s286_s13 = scalar_lea.vmem [#allocation7], %s536_s25 }
  0x42   : > { %293 = vadd.xlane.f32.xlu0 %v292_v1  ;;  %553 = vmatpush3.msra.mxu0 %v327_v4  ;;  %v324_v8 = vld [vmem:[#allocation5] sm:$0xff]  ;;  %v539_v19 = vld [vmem:[%s1009_s1] ss:$0 sm:$0xff]  ;;  %s424_s14 = sshll.u32 %s286_s13, 4  ;;  %s966_s15 = scalar_lea.hbm %s1013_s5, %s544_s12  ;;  %s425_s14 = int_to_ptr.vmem [resolvable:$true] %s424_s14 }
  0x43   : > { %v296_v3 = vsel %vm291_vm0, %v295_v2, 0.0  ;;  %554 = vmatprep.subr.mxu0 %v786_v5  ;;  %v540_v21 = vld [vmem:[%s1010_s2] ss:$0 sm:$0xff]  ;;  %s410_s8 = scalar_lea.sflag [#allocation4], %s934_s16  ;;  %s696_s6 = scalar_lea.vmem %s425_s14, 128 }
  0x44   : > { %555 = vmatpush3.msra.mxu0 %v326_v6  ;;  %v541_v24 = vld [vmem:[%s1012_s4] ss:$0 sm:$0xff]  ;;  %p697_p1 = scmp.ne.s32.totalorder %s425_s14, %s696_s6  ;;  %s788_s21 = smov [#allocation7]  }
  0x45   : > { %556 = vmatprep.subr.mxu0 %v786_v5  ;;  %s700_s9 = sshll.u32 %s788_s21, 4  ;;  %s701_s9 = int_to_ptr.vmem [resolvable:$false] %s700_s9 }
  0x46   : > { %297 = vadd.xlane.f32.xlu0 %v296_v3  ;;  %557 = vmatpush3.msra.mxu0 %v325_v7  ;;  %p698_p8 = pnand %p697_p1, %p906_p13  ;;  %s702_s25 = scalar_lea.vmem %s701_s9, 256 }
  0x47   : > { %558 = vmatprep.subr.mxu0 %v786_v5  ;;  %p703_p0 = scmp.lt.s32.totalorder %s425_s14, %s701_s9  ;;  %p704_p2 = scmp.lt.s32.totalorder %s702_s25, %s696_s6 }
  0x48   : > { %559 = vmatpush3.msra.mxu0 %v324_v8  ;;  %p699_p10 = pneg %p698_p8 }
  0x49   : > { %p705_p3 = por %p704_p2, %p703_p0 }
  0x4b   : > { %p706_p5 = pnand %p705_p3, %p699_p10 }
  0xcb   : > { %v294_v9 = vpop.xlane.xlu0 %293 }
  0xcc   : > { %v299_v10 = vmul.f32 0.03125, %v294_v9 }
  0xce   : > { %v301_v12 = vmul.f32 %v299_v10, %v299_v10  ;;  %v304_v17 = vsub.f32 %v290_v0, %v299_v10 }
  0xcf   : > { %v298_v11 = vpop.xlane.xlu0 %297 }
  0xd0   : > { %v300_v13 = vmul.f32 0.03125, %v298_v11 }
  0xd2   : > { %v302_v14 = vsub.f32 %v300_v13, %v301_v12 }
  0xd4   : > { %v303_v15 = vmax.f32 %v302_v14, 0.0 }
  0xd6   : > { %v305_v16 = vadd.f32 1e-05, %v303_v15 }
  0xd8   : > { %640 = vrsqrt.f32 %v305_v16 }
  0xe5   : > { %v641_v18 = vpop.eup %640 }
  0xe6   : > { %v307_v20 = vmul.f32 %v641_v18, %v304_v17 }
  0xe8   : > { %v315_v22 = vmul.f32 %v539_v19, %v307_v20 }
  0xea   : > { %v323_v23 = vadd.f32 %v540_v21, %v315_v22 }
  0xec   : > { %561 = vmatmul.mubr.msk.f32.vlgmr.msra.gmra.mxu0 %vm291_vm0, %v323_v23 }
 0x1ac   : > { %v404_v25 = vpop.f32.mrf.mxu0 }
 0x1ad   : > { %v405_v26 = vadd.f32 %v541_v24, %v404_v25 }
 0x1ae   : > { %v562_v27 = vpop.f32.mrf.mxu0 }
 0x1af   : > { %408 = vst [vmem:[%s286_s13] sm:$0xff] %v405_v26 }
 0x1b0   : > { %709 = shalt.err (!%p706_p5)
}
 0x1b1   : > { %s710_s3 = scalar_lea.hbm %s966_s15, 128  ;;  %s714_s28 = scalar_lea.hbm %s1013_s5, 256 }
 0x1b2   : > { %p711_p7 = scmp.ne.s32.totalorder %s966_s15, %s710_s3  ;;  %p715_p9 = scmp.lt.s32.totalorder %s966_s15, %s1013_s5 }
 0x1b3   : > { %p716_p11 = scmp.lt.s32.totalorder %s714_s28, %s710_s3 }
 0x1b4   : > { %p712_p6 = pnand %p711_p7, %p906_p13 }
 0x1b5   : > { %p717_p12 = por %p716_p11, %p715_p9 }
 0x1b6   : > { %p713_p4 = pneg %p712_p6 }
 0x1b8   : > { %p718_p1 = pnand %p717_p12, %p713_p4 }
 0x1ba   : > { %721 = shalt.err (!%p718_p1)
}
 0x1bb   : > { %569 = dma.vmem_to_hbm [thread:$0]  (%p906_p13), %s425_s14, 128, %s966_s15, %s410_s8  }
 0x1bc PF: > { %s436_s11 = sand.u32 1, %s760_s18   ;;  %p1029_p8 = scmp.ne.s32.totalorder %s1020_s29, 0 }
 0x1bd   : > { %p1030_p10 = scmp.ge.s32.totalorder %s780_s23, 2  ;;  %s437_s12 = scalar_lea.sflag [#allocation4], %s436_s11 }
 0x1bf   : > { %p580_p0 = pnand %p1030_p10, %p1029_p8 }
 0x1c1   : > { %p581_p2 = pneg %p580_p0 }
 0x1c3   : > { %755 = dma.done.wait (%p581_p2), %s437_s12, 128  }
 0x1c4   : > { %757 = vsyncadd (%p581_p2), %s437_s12, 4294967168  ;;  %s22_s23 = sadd.s32 1, %s780_s23   ;;  %s1031_s17 = sld [smem:[#allocation11_spill]] }
 0x1c5   : > { %p19_p3 = scmp.ge.s32.totalorder %s22_s23, 4   ;;  %s1032_s18 = smov %s764_s19 }
 0x1c6   : > { %s1033_s19 = smov %s768_s20  ;;  %s1034_s20 = smov %s915_s7 }
 0x1c7   : > { %s1035_s21 = smov %s776_s22  ;;  %21 = sbr.rel (!%p19_p3) target bundleno = 9 (0x9), region = 93 }
 0x1ca   : > { %s1036_s22 = smov %s1031_s17 }
 0x1cc   :  { %442 = vsyncpa [#allocation3], 1 }
 0x1cd   :  { %444 = vsyncpa [#allocation3 + $0x1], 1 }
 0x1ce   :  { %445 = vsyncpa [#allocation6], 1 }
 0x1cf   :  { %446 = vsyncpa [#allocation4], 1 }
 0x1d0   :  { %448 = vsyncpa [#allocation4 + $0x1], 1 }

</bundles_post_ra>
